<compile_context>
chip_gen: v7x
topology: tpu7x:2x2x1
jax: 0.10.0
libtpu: 0.0.40
codegen_flags: <defaults>
</compile_context>

<pallas_src>
import math

import numpy as np

import jax
import jax.numpy as jnp
from jax import lax
from jax.experimental import pallas as pl
from jax.experimental.pallas import tpu as pltpu

_NEG_INF = -1000000000.0              # matches torch masked_fill value
_VMEM_HEADROOM = 16 * 1024 * 1024     # headroom for Mosaic internal scratch


def _vmem_capacity_bytes():
    """Physical VMEM per core; conservative v7x (64 MiB) fallback."""
    try:
        cap = int(pltpu.get_tpu_info().vmem_capacity_bytes)
        if cap > 0:
            return cap
    except Exception:
        pass
    return 64 * 1024 * 1024


# --------------------------------------------------------------------------
# Kernels
# --------------------------------------------------------------------------
def _make_row_kernel(has_tree, has_leaf, has_mask, scale):
    """General path: one (tq, L) query slab; K/V resident per (b, h)."""

    def kernel(*refs):
        it = iter(refs)
        q_ref = next(it)                              # (tq, D)
        k_ref = next(it)                              # (L, D)  resident
        v_ref = next(it)                              # (L, D)  resident
        tree_ref = next(it) if has_tree else None     # (tq, L)
        leaf_ref = next(it) if has_leaf else None     # (tq, L)
        mask_ref = next(it) if has_mask else None     # (tq, L) int8
        out_ref = next(it)                            # (tq, D)
        p_ref = next(it)                              # (tq, L)

        q = q_ref[...]
        if not (has_tree or has_leaf):
            # Fold softmax scale into the (tq, D) query tile (fewer VALU ops
            # than scaling the (tq, L) score matrix; no additive terms exist).
            q = q * scale

        # s[i, j] = sum_k q[i, k] * key[j, k]  (native-dtype MXU, f32 acc)
        s = lax.dot_general(
            q, k_ref[...],
            dimension_numbers=(((1,), (1,)), ((), ())),
            preferred_element_type=jnp.float32)

        if has_tree:
            s = s + tree_ref[...].astype(jnp.float32)
        if has_leaf:
            s = s + leaf_ref[...].astype(jnp.float32)
        if has_tree or has_leaf:
            s = s * jnp.float32(scale)
        if has_mask:
            s = jnp.where(mask_ref[...] != 0, jnp.float32(_NEG_INF), s)

        # Numerically-stable softmax over keys.
        m = jnp.max(s, axis=-1, keepdims=True)
        e = jnp.exp(s - m)
        denom = jnp.sum(e, axis=-1, keepdims=True)
        p = e * pl.reciprocal(denom, approx=True)     # divide -> EUP slot

        p_lo = p.astype(v_ref.dtype)                  # single cast, reused
        if p_ref.dtype == v_ref.dtype:
            p_ref[...] = p_lo
        else:
            p_ref[...] = p.astype(p_ref.dtype)

        out_ref[...] = lax.dot_general(
            p_lo, v_ref[...],
            dimension_numbers=(((1,), (0,)), ((), ())),
            preferred_element_type=jnp.float32).astype(out_ref.dtype)

    return kernel


def _make_fused_head_kernel(has_tree, has_leaf, has_mask, scale):
    """Small-L fast path: all heads of one batch element per grid step."""

    def kernel(*refs):
        it = iter(refs)
        q_ref = next(it)                              # (H, L, D)
        k_ref = next(it)                              # (H, L, D)
        v_ref = next(it)                              # (H, L, D)
        tree_ref = next(it) if has_tree else None     # (H, L, L)
        leaf_ref = next(it) if has_leaf else None     # (H, L, L)
        mask_ref = next(it) if has_mask else None     # (1, L, L) int8
        out_ref = next(it)                            # (H, L, D)
        p_ref = next(it)                              # (H, L, L)

        q = q_ref[...]
        if not (has_tree or has_leaf):
            q = q * scale

        # Batched over heads: s[h, i, j] = sum_k q[h, i, k] * key[h, j, k]
        s = lax.dot_general(
            q, k_ref[...],
            dimension_numbers=(((2,), (2,)), ((0,), (0,))),
            preferred_element_type=jnp.float32)

        if has_tree:
            s = s + tree_ref[...].astype(jnp.float32)
        if has_leaf:
            s = s + leaf_ref[...].astype(jnp.float32)
        if has_tree or has_leaf:
            s = s * jnp.float32(scale)
        if has_mask:
            # mask is (1, L, L); broadcasts over heads.
            s = jnp.where(mask_ref[...] != 0, jnp.float32(_NEG_INF), s)

        m = jnp.max(s, axis=-1, keepdims=True)
        e = jnp.exp(s - m)
        denom = jnp.sum(e, axis=-1, keepdims=True)
        p = e * pl.reciprocal(denom, approx=True)

        p_lo = p.astype(v_ref.dtype)
        if p_ref.dtype == v_ref.dtype:
            p_ref[...] = p_lo
        else:
            p_ref[...] = p.astype(p_ref.dtype)

        out_ref[...] = lax.dot_general(
            p_lo, v_ref[...],
            dimension_numbers=(((2,), (1,)), ((0,), (0,))),
            preferred_element_type=jnp.float32).astype(out_ref.dtype)

    return kernel


# --------------------------------------------------------------------------
# VMEM footprint estimates (Pallas double-buffers each pipelined stream)
# --------------------------------------------------------------------------
def _tiled_footprint(tq, L, D, q_b, k_b, v_b, o_b, p_b, t_b, l_b, has_mask):
    nbuf = 2
    f = nbuf * tq * D * q_b                 # Q slab
    f += nbuf * L * D * (k_b + v_b)         # resident K / V
    f += nbuf * tq * L * (t_b + l_b)        # tree / leaf slabs (0 if absent)
    if has_mask:
        f += nbuf * tq * L                  # int8 mask slab
    f += nbuf * tq * D * o_b                # attn_sum slab
    f += nbuf * tq * L * p_b                # p_attn slab
    f += 4 * tq * L * 4                     # f32 temporaries (s, e, p, p_lo)
    return f


def _fused_head_footprint(H, L, D, q_b, k_b, v_b, o_b, p_b, t_b, l_b, has_mask):
    nbuf = 2
    f = nbuf * H * L * D * (q_b + k_b + v_b + o_b)
    f += nbuf * H * L * L * (t_b + l_b + p_b)
    if has_mask:
        f += nbuf * L * L                   # int8, shared across heads
    f += 4 * H * L * L * 4                  # f32 temporaries
    return f


def _vmem_limit(footprint, budget):
    return int(min(budget, max(32 << 20, footprint + (8 << 20))))


# --------------------------------------------------------------------------
# pallas_call wrappers
# --------------------------------------------------------------------------
def _fused_head_call(query, key, value, mask_i8, tree_score, leaf_score,
                     scale, p_dtype, vmem_limit, flags):
    B, H, L, D = query.shape
    has_tree, has_leaf, has_mask = flags

    def bmap(b):
        return (b, 0, 0, 0)

    qkv_spec = pl.BlockSpec((None, H, L, D), bmap)
    score_spec = pl.BlockSpec((None, H, L, L), bmap)
    mask_spec = pl.BlockSpec((None, 1, L, L), bmap)

    in_specs = [qkv_spec, qkv_spec, qkv_spec]
    inputs = [query, key, value]
    if has_tree:
        in_specs.append(score_spec)
        inputs.append(tree_score)
    if has_leaf:
        in_specs.append(score_spec)
        inputs.append(leaf_score)
    if has_mask:
        in_specs.append(mask_spec)
        inputs.append(mask_i8)

    out_shapes = (
        jax.ShapeDtypeStruct((B, H, L, D), query.dtype),   # attn_sum
        jax.ShapeDtypeStruct((B, H, L, L), p_dtype),       # p_attn
    )
    out_specs = [qkv_spec, score_spec]

    kernel = _make_fused_head_kernel(has_tree, has_leaf, has_mask, scale)

    return pl.pallas_call(
        kernel,
        out_shape=out_shapes,
        grid_spec=pltpu.PrefetchScalarGridSpec(
            num_scalar_prefetch=0,
            grid=(B,),
            in_specs=in_specs,
            out_specs=out_specs,
        ),
        compiler_params=pltpu.CompilerParams(
            dimension_semantics=("parallel",),
            vmem_limit_bytes=vmem_limit,
        ),
    )(*inputs)


def _tiled_call(query, key, value, mask_i8, tree_score, leaf_score,
                scale, p_dtype, tq, vmem_limit, flags):
    B, H, L, D = query.shape
    has_tree, has_leaf, has_mask = flags
    nq = pl.cdiv(L, tq)

    def bh_qtile(b, h, i):
        return (b, h, i, 0)

    def bh_resident(b, h, i):   # K / V: ignore q-tile axis -> DMA once per (b,h)
        return (b, h, 0, 0)

    def b_qtile(b, h, i):       # mask broadcasts over heads
        return (b, 0, i, 0)

    q_spec = pl.BlockSpec((None, None, tq, D), bh_qtile)
    kv_spec = pl.BlockSpec((None, None, L, D), bh_resident)
    row_spec = pl.BlockSpec((None, None, tq, L), bh_qtile)
    mask_spec = pl.BlockSpec((None, None, tq, L), b_qtile)

    in_specs = [q_spec, kv_spec, kv_spec]
    inputs = [query, key, value]
    if has_tree:
        in_specs.append(row_spec)
        inputs.append(tree_score)
    if has_leaf:
        in_specs.append(row_spec)
        inputs.append(leaf_score)
    if has_mask:
        in_specs.append(mask_spec)
        inputs.append(mask_i8)

    out_shapes = (
        jax.ShapeDtypeStruct((B, H, L, D), query.dtype),   # attn_sum
        jax.ShapeDtypeStruct((B, H, L, L), p_dtype),       # p_attn
    )
    out_specs = [q_spec, row_spec]

    kernel = _make_row_kernel(has_tree, has_leaf, has_mask, scale)

    return pl.pallas_call(
        kernel,
        out_shape=out_shapes,
        grid_spec=pltpu.PrefetchScalarGridSpec(
            num_scalar_prefetch=0,
            grid=(B, H, nq),
            in_specs=in_specs,
            out_specs=out_specs,
        ),
        compiler_params=pltpu.CompilerParams(
            # B / H are independent (megacore shardable). Keep the q-tile
            # axis "arbitrary" so a 2-TC chip does not split it across cores
            # and re-fetch the resident K/V block on both.
            dimension_semantics=("parallel", "parallel", "arbitrary"),
            vmem_limit_bytes=vmem_limit,
        ),
    )(*inputs)


# --------------------------------------------------------------------------
# Public entry point
# --------------------------------------------------------------------------
def relation_aware_attention(query, key, value, mask=None,
                             tree_score=None, leaf_score=None,
                             *, use_tree=True, use_leaf=True,
                             q_block=128, p_attn_dtype=None):
    """Pallas implementation of RelationAwareAttention.forward (eval mode).

    p_attn_dtype: dtype for the returned probability matrix. Default keeps
    query.dtype (PyTorch parity). Pass jnp.bfloat16 to halve the largest
    HBM writeback stream when full precision of p_attn is not needed.
    """
    B, H, L, D = query.shape

    sqrt_count = 1 + int(bool(use_tree)) + int(bool(use_leaf))
    scale = 1.0 / math.sqrt(sqrt_count * D)

    has_tree = tree_score is not None
    has_leaf = leaf_score is not None
    has_mask = mask is not None
    flags = (has_tree, has_leaf, has_mask)

    p_dtype = np.dtype(query.dtype if p_attn_dtype is None else p_attn_dtype)

    # Carry the mask as int8 0/1 (1 byte/elem): this kernel is HBM-bound when
    # the L^2 streams are present, so mask bytes are a direct wall-clock cost.
    # `!= 0` matches masked_fill semantics for bool / any nonzero encoding.
    mask_i8 = (mask != 0).astype(jnp.int8) if has_mask else None

    cap = _vmem_capacity_bytes()
    budget = max(cap - _VMEM_HEADROOM, 24 << 20)

    q_b = np.dtype(query.dtype).itemsize
    k_b = np.dtype(key.dtype).itemsize
    v_b = np.dtype(value.dtype).itemsize
    o_b = q_b
    p_b = p_dtype.itemsize
    t_b = np.dtype(tree_score.dtype).itemsize if has_tree else 0
    l_b = np.dtype(leaf_score.dtype).itemsize if has_leaf else 0

    # ---- small-L fast path: fold heads into one block, grid over batch only.
    if L <= 128:
        foot = _fused_head_footprint(H, L, D, q_b, k_b, v_b, o_b, p_b,
                                     t_b, l_b, has_mask)
        if foot <= budget:
            return _fused_head_call(query, key, value, mask_i8, tree_score,
                                    leaf_score, scale, p_dtype,
                                    _vmem_limit(foot, budget), flags)

    # ---- general path: (tq, L) query slabs, K/V resident per (b, h).
    tq = L if L <= q_block else q_block
    foot = _tiled_footprint(tq, L, D, q_b, k_b, v_b, o_b, p_b, t_b, l_b,
                            has_mask)

    # v5e/v6e (128 MiB VMEM): a 256-row slab amortizes per-step overhead and
    # feeds the MXU a larger M; keep 128 on v7x (64 MiB VMEM).
    if cap >= (100 << 20) and L >= 2 * tq and tq == q_block:
        cand = 2 * tq
        cand_foot = _tiled_footprint(cand, L, D, q_b, k_b, v_b, o_b, p_b,
                                     t_b, l_b, has_mask)
        if cand_foot <= budget:
            tq, foot = cand, cand_foot

    # Shrink the slab if the footprint does not fit the VMEM budget.
    while foot > budget and tq > 32:
        tq = max(32, tq // 2)
        foot = _tiled_footprint(tq, L, D, q_b, k_b, v_b, o_b, p_b, t_b, l_b,
                                has_mask)
    # TODO(synk): for very long L where resident (L, D) K/V still exceeds the
    # budget, fall back to a key-tiled online-softmax (flash-style) variant.

    return _tiled_call(query, key, value, mask_i8, tree_score, leaf_score,
                       scale, p_dtype, tq, _vmem_limit(foot, budget), flags)


# --------------------------------------------------------------------------
# Reference + self-test
# --------------------------------------------------------------------------
def _reference(query, key, value, mask=None, tree_score=None, leaf_score=None,
               sqrt_count=3):
    """Pure-JAX reference mirroring the PyTorch forward."""
    s = jnp.einsum('bhik,bhjk->bhij', query, key)
    if tree_score is not None:
        s = s + tree_score
    if leaf_score is not None:
        s = s + leaf_score
    s = s / math.sqrt(sqrt_count * query.shape[-1])
    if mask is not None:
        s = jnp.where(mask, _NEG_INF, s)
    p = jax.nn.softmax(s, axis=-1)
    out = jnp.einsum('bhij,bhjk->bhik', p, value)
    return out, p


def _check(name, got, want, atol, rtol):
    assert got.shape == want.shape, (name, got.shape, want.shape)
    assert jnp.allclose(got, want, atol=atol, rtol=rtol), name


if __name__ == "__main__":
    # --- case 1: small-L head-fused path, all relation inputs present -------
    B, H, L, D = 2, 4, 16, 32   # bs, heads, max_code_length, hidden // head
    kq, kk, kv, kt, kl, km = jax.random.split(jax.random.PRNGKey(0), 6)
    query = jax.random.normal(kq, (B, H, L, D), jnp.float32)
    key_t = jax.random.normal(kk, (B, H, L, D), jnp.float32)
    value = jax.random.normal(kv, (B, H, L, D), jnp.float32)
    tree_score = jax.random.normal(kt, (B, H, L, L), jnp.float32)
    leaf_score = jax.random.normal(kl, (B, H, L, L), jnp.float32)
    mask = jax.random.uniform(km, (B, 1, L, L)) < 0.2   # True == masked

    attn_sum, p_attn = relation_aware_attention(
        query, key_t, value, mask, tree_score, leaf_score,
        use_tree=True, use_leaf=True)
    jax.block_until_ready((attn_sum, p_attn))

    ref_out, ref_p = _reference(query, key_t, value, mask, tree_score,
                                leaf_score, sqrt_count=3)
    _check("attn_sum/fused", attn_sum, ref_out, atol=2e-3, rtol=2e-3)
    _check("p_attn/fused", p_attn, ref_p, atol=2e-3, rtol=2e-3)

    # --- case 2: longer sequence (tiled path), mask only ---------------------
    B2, H2, L2, D2 = 1, 2, 256, 32
    kq2, kk2, kv2, km2 = jax.random.split(jax.random.PRNGKey(1), 4)
    q2 = jax.random.normal(kq2, (B2, H2, L2, D2), jnp.float32)
    k2 = jax.random.normal(kk2, (B2, H2, L2, D2), jnp.float32)
    v2 = jax.random.normal(kv2, (B2, H2, L2, D2), jnp.float32)
    m2 = jax.random.uniform(km2, (B2, 1, L2, L2)) < 0.2

    attn_sum2, p_attn2 = relation_aware_attention(
        q2, k2, v2, m2, None, None, use_tree=True, use_leaf=True)
    jax.block_until_ready((attn_sum2, p_attn2))

    ref_out2, ref_p2 = _reference(q2, k2, v2, m2, None, None, sqrt_count=3)
    _check("attn_sum/tiled", attn_sum2, ref_out2, atol=2e-3, rtol=2e-3)
    _check("p_attn/tiled", p_attn2, ref_p2, atol=2e-3, rtol=2e-3)

    print("KERNEL_OK")
</pallas_src>

<mosaic_0001>
module attributes {stable_mosaic.version = 11 : i64} {
  func.func @kernel(%arg0: i32, %arg1: memref<1x4x16x32xf32, #tpu.memory_space<vmem>>, %arg2: memref<1x4x16x32xf32, #tpu.memory_space<vmem>>, %arg3: memref<1x4x16x32xf32, #tpu.memory_space<vmem>>, %arg4: memref<1x4x16x16xf32, #tpu.memory_space<vmem>>, %arg5: memref<1x4x16x16xf32, #tpu.memory_space<vmem>>, %arg6: memref<1x1x16x16xi8, #tpu.memory_space<vmem>>, %arg7: memref<1x4x16x32xf32, #tpu.memory_space<vmem>>, %arg8: memref<1x4x16x16xf32, #tpu.memory_space<vmem>>) attributes {dimension_semantics = [#tpu.dimension_semantics<parallel>], iteration_bounds = array<i64: 2>, scalar_prefetch = 0 : i64, scratch_operands = 0 : i64, tpu.core_type = #tpu.core_type<tc>, window_params = [{transform_indices = @transform_0, window_bounds = array<i64: 1, 4, 16, 32>}, {transform_indices = @transform_1, window_bounds = array<i64: 1, 4, 16, 32>}, {transform_indices = @transform_2, window_bounds = array<i64: 1, 4, 16, 32>}, {transform_indices = @transform_3, window_bounds = array<i64: 1, 4, 16, 16>}, {transform_indices = @transform_4, window_bounds = array<i64: 1, 4, 16, 16>}, {transform_indices = @transform_5, window_bounds = array<i64: 1, 1, 16, 16>}, {transform_indices = @transform_6, window_bounds = array<i64: 1, 4, 16, 32>}, {transform_indices = @transform_7, window_bounds = array<i64: 1, 4, 16, 16>}]} {
    %c0 = arith.constant 0 : index
    %c0_0 = arith.constant 0 : index
    %c0_1 = arith.constant 0 : index
    %c0_2 = arith.constant 0 : index
    %0 = vector.load %arg1[%c0, %c0_0, %c0_1, %c0_2] : memref<1x4x16x32xf32, #tpu.memory_space<vmem>>, vector<1x4x16x32xf32>
    %1 = vector.shape_cast %0 : vector<1x4x16x32xf32> to vector<4x16x32xf32>
    %c0_3 = arith.constant 0 : index
    %c0_4 = arith.constant 0 : index
    %c0_5 = arith.constant 0 : index
    %c0_6 = arith.constant 0 : index
    %2 = vector.load %arg2[%c0_3, %c0_4, %c0_5, %c0_6] : memref<1x4x16x32xf32, #tpu.memory_space<vmem>>, vector<1x4x16x32xf32>
    %3 = vector.shape_cast %2 : vector<1x4x16x32xf32> to vector<4x16x32xf32>
    %cst = arith.constant dense<0.000000e+00> : vector<4x16x16xf32>
    %4 = tpu.matmul %1, %3, %cst {dimension_numbers = #tpu.dot_dimension_numbers<[2], [2], [1], [1], [0, 0, 0, 1, 1, 1], [0], [0]>} : vector<4x16x32xf32>, vector<4x16x32xf32>, vector<4x16x16xf32> -> vector<4x16x16xf32>
    %c0_7 = arith.constant 0 : index
    %c0_8 = arith.constant 0 : index
    %c0_9 = arith.constant 0 : index
    %c0_10 = arith.constant 0 : index
    %5 = vector.load %arg4[%c0_7, %c0_8, %c0_9, %c0_10] : memref<1x4x16x16xf32, #tpu.memory_space<vmem>>, vector<1x4x16x16xf32>
    %6 = vector.shape_cast %5 : vector<1x4x16x16xf32> to vector<4x16x16xf32>
    %7 = arith.addf %4, %6 : vector<4x16x16xf32>
    %c0_11 = arith.constant 0 : index
    %c0_12 = arith.constant 0 : index
    %c0_13 = arith.constant 0 : index
    %c0_14 = arith.constant 0 : index
    %8 = vector.load %arg5[%c0_11, %c0_12, %c0_13, %c0_14] : memref<1x4x16x16xf32, #tpu.memory_space<vmem>>, vector<1x4x16x16xf32>
    %9 = vector.shape_cast %8 : vector<1x4x16x16xf32> to vector<4x16x16xf32>
    %10 = arith.addf %7, %9 : vector<4x16x16xf32>
    %cst_15 = arith.constant 0.102062076 : f32
    %11 = vector.broadcast %cst_15 : f32 to vector<4x16x16xf32>
    %12 = arith.mulf %10, %11 : vector<4x16x16xf32>
    %c0_16 = arith.constant 0 : index
    %c0_17 = arith.constant 0 : index
    %c0_18 = arith.constant 0 : index
    %c0_19 = arith.constant 0 : index
    %13 = vector.load %arg6[%c0_16, %c0_17, %c0_18, %c0_19] : memref<1x1x16x16xi8, #tpu.memory_space<vmem>>, vector<1x1x16x16xi8>
    %14 = vector.shape_cast %13 : vector<1x1x16x16xi8> to vector<1x16x16xi8>
    %c0_i8 = arith.constant 0 : i8
    %15 = vector.broadcast %c0_i8 : i8 to vector<1x16x16xi8>
    %16 = arith.cmpi ne, %14, %15 : vector<1x16x16xi8>
    %cst_20 = arith.constant -1.000000e+09 : f32
    %17 = vector.shape_cast %16 : vector<1x16x16xi1> to vector<1x16x16xi1>
    %18 = vector.broadcast %17 : vector<1x16x16xi1> to vector<4x16x16xi1>
    %19 = vector.broadcast %cst_20 : f32 to vector<4x16x16xf32>
    %20 = arith.select %18, %19, %12 : vector<4x16x16xi1>, vector<4x16x16xf32>
    %cst_21 = arith.constant dense<0xFF800000> : vector<4x16xf32>
    %21 = vector.multi_reduction <maximumf>, %20, %cst_21 [2] : vector<4x16x16xf32> to vector<4x16xf32>
    %22 = vector.shape_cast %21 : vector<4x16xf32> to vector<4x16x1xf32>
    %23 = vector.broadcast %22 : vector<4x16x1xf32> to vector<4x16x16xf32>
    %24 = arith.subf %20, %23 : vector<4x16x16xf32>
    %25 = math.exp %24 : vector<4x16x16xf32>
    %cst_22 = arith.constant dense<0.000000e+00> : vector<4x16xf32>
    %26 = vector.multi_reduction <add>, %25, %cst_22 [2] : vector<4x16x16xf32> to vector<4x16xf32>
    %27 = vector.shape_cast %26 : vector<4x16xf32> to vector<4x16x1xf32>
    %28 = tpu.reciprocal %27 {approx = true} : vector<4x16x1xf32> -> vector<4x16x1xf32>
    %29 = vector.broadcast %28 : vector<4x16x1xf32> to vector<4x16x16xf32>
    %30 = arith.mulf %25, %29 : vector<4x16x16xf32>
    %c0_23 = arith.constant 0 : index
    %c0_24 = arith.constant 0 : index
    %c0_25 = arith.constant 0 : index
    %c0_26 = arith.constant 0 : index
    %31 = vector.load %arg8[%c0_23, %c0_24, %c0_25, %c0_26] : memref<1x4x16x16xf32, #tpu.memory_space<vmem>>, vector<1x4x16x16xf32>
    %32 = vector.shape_cast %31 : vector<1x4x16x16xf32> to vector<4x16x16xf32>
    %33 = vector.shape_cast %30 : vector<4x16x16xf32> to vector<1x4x16x16xf32>
    tpu.vector_store %arg8[%c0_23, %c0_24, %c0_25, %c0_26], %33 {strides = array<i32>} : memref<1x4x16x16xf32, #tpu.memory_space<vmem>>, vector<1x4x16x16xf32>,
    %c0_27 = arith.constant 0 : index
    %c0_28 = arith.constant 0 : index
    %c0_29 = arith.constant 0 : index
    %c0_30 = arith.constant 0 : index
    %34 = vector.load %arg3[%c0_27, %c0_28, %c0_29, %c0_30] : memref<1x4x16x32xf32, #tpu.memory_space<vmem>>, vector<1x4x16x32xf32>
    %35 = vector.shape_cast %34 : vector<1x4x16x32xf32> to vector<4x16x32xf32>
    %cst_31 = arith.constant dense<0.000000e+00> : vector<4x16x32xf32>
    %36 = tpu.matmul %30, %35, %cst_31 {dimension_numbers = #tpu.dot_dimension_numbers<[2], [1], [1], [2], [0, 0, 0, 1, 1, 2], [0], [0]>} : vector<4x16x16xf32>, vector<4x16x32xf32>, vector<4x16x32xf32> -> vector<4x16x32xf32>
    %c0_32 = arith.constant 0 : index
    %c0_33 = arith.constant 0 : index
    %c0_34 = arith.constant 0 : index
    %c0_35 = arith.constant 0 : index
    %37 = vector.load %arg7[%c0_32, %c0_33, %c0_34, %c0_35] : memref<1x4x16x32xf32, #tpu.memory_space<vmem>>, vector<1x4x16x32xf32>
    %38 = vector.shape_cast %37 : vector<1x4x16x32xf32> to vector<4x16x32xf32>
    %39 = vector.shape_cast %36 : vector<4x16x32xf32> to vector<1x4x16x32xf32>
    tpu.vector_store %arg7[%c0_32, %c0_33, %c0_34, %c0_35], %39 {strides = array<i32>} : memref<1x4x16x32xf32, #tpu.memory_space<vmem>>, vector<1x4x16x32xf32>,
    return
  }
  func.func @transform_0(%arg0: i32) -> (i32, i32, i32, i32) {
    %c0_i32 = arith.constant 0 : i32
    %c0_i32_0 = arith.constant 0 : i32
    %c0_i32_1 = arith.constant 0 : i32
    %c0_i32_2 = arith.constant 0 : i32
    return %arg0, %c0_i32, %c0_i32_0, %c0_i32_1 : i32, i32, i32, i32
  }
  func.func @transform_1(%arg0: i32) -> (i32, i32, i32, i32) {
    %c0_i32 = arith.constant 0 : i32
    %c0_i32_0 = arith.constant 0 : i32
    %c0_i32_1 = arith.constant 0 : i32
    %c0_i32_2 = arith.constant 0 : i32
    return %arg0, %c0_i32, %c0_i32_0, %c0_i32_1 : i32, i32, i32, i32
  }
  func.func @transform_2(%arg0: i32) -> (i32, i32, i32, i32) {
    %c0_i32 = arith.constant 0 : i32
    %c0_i32_0 = arith.constant 0 : i32
    %c0_i32_1 = arith.constant 0 : i32
    %c0_i32_2 = arith.constant 0 : i32
    return %arg0, %c0_i32, %c0_i32_0, %c0_i32_1 : i32, i32, i32, i32
  }
  func.func @transform_3(%arg0: i32) -> (i32, i32, i32, i32) {
    %c0_i32 = arith.constant 0 : i32
    %c0_i32_0 = arith.constant 0 : i32
    %c0_i32_1 = arith.constant 0 : i32
    %c0_i32_2 = arith.constant 0 : i32
    return %arg0, %c0_i32, %c0_i32_0, %c0_i32_1 : i32, i32, i32, i32
  }
  func.func @transform_4(%arg0: i32) -> (i32, i32, i32, i32) {
    %c0_i32 = arith.constant 0 : i32
    %c0_i32_0 = arith.constant 0 : i32
    %c0_i32_1 = arith.constant 0 : i32
    %c0_i32_2 = arith.constant 0 : i32
    return %arg0, %c0_i32, %c0_i32_0, %c0_i32_1 : i32, i32, i32, i32
  }
  func.func @transform_5(%arg0: i32) -> (i32, i32, i32, i32) {
    %c0_i32 = arith.constant 0 : i32
    %c0_i32_0 = arith.constant 0 : i32
    %c0_i32_1 = arith.constant 0 : i32
    %c0_i32_2 = arith.constant 0 : i32
    return %arg0, %c0_i32, %c0_i32_0, %c0_i32_1 : i32, i32, i32, i32
  }
  func.func @transform_6(%arg0: i32) -> (i32, i32, i32, i32) {
    %c0_i32 = arith.constant 0 : i32
    %c0_i32_0 = arith.constant 0 : i32
    %c0_i32_1 = arith.constant 0 : i32
    %c0_i32_2 = arith.constant 0 : i32
    return %arg0, %c0_i32, %c0_i32_0, %c0_i32_1 : i32, i32, i32, i32
  }
  func.func @transform_7(%arg0: i32) -> (i32, i32, i32, i32) {
    %c0_i32 = arith.constant 0 : i32
    %c0_i32_0 = arith.constant 0 : i32
    %c0_i32_1 = arith.constant 0 : i32
    %c0_i32_2 = arith.constant 0 : i32
    return %arg0, %c0_i32, %c0_i32_0, %c0_i32_1 : i32, i32, i32, i32
  }
}

</mosaic_0001>

<bundles_post_ra>
// kernel: tpu_custom_call.1
= control target key start
LH: loop header
LB: loop body
LE: loop exit
PB: predicated region body
PF: predicated region fallthrough
CT: control target
= control target key end

     0   :  { %s2749_s0 = inlined_call_operand.hbm [shape: f32[2,4,16,32], index: 0, kind: input, shape index: {}]   ;;  %s2750_s1 = inlined_call_operand.hbm [shape: f32[2,4,16,32], index: 1, kind: input, shape index: {}]   ;;  %s2751_s2 = inlined_call_operand.hbm [shape: f32[2,4,16,32], index: 2, kind: input, shape index: {}]   ;;  %s2752_s3 = inlined_call_operand.hbm [shape: f32[2,4,16,16], index: 3, kind: input, shape index: {}]   ;;  %s2753_s4 = inlined_call_operand.hbm [shape: f32[2,4,16,16], index: 4, kind: input, shape index: {}]   ;;  %s2754_s5 = inlined_call_operand.vmem [shape: s8[2,1,16,16], index: 5, kind: input, shape index: {}]   ;;  %s2755_s6 = inlined_call_operand.hbm [shape: f32[2,4,16,32], index: 6, kind: output, shape index: {0}]   ;;  %s2756_s7 = inlined_call_operand.hbm [shape: f32[2,4,16,16], index: 7, kind: output, shape index: {1}]  }
   0x1   :  { %2772 = sst [smem:[#allocation24_spill]] %s2749_s0 }
   0x2   :  { %2773 = sst [smem:[#allocation25_spill]] %s2750_s1 }
   0x3   :  { %2774 = sst [smem:[#allocation26_spill]] %s2752_s3 }
   0x4   :  { %2775 = sst [smem:[#allocation27_spill]] %s2755_s6 }
   0x5   :  { %2776 = sst [smem:[#allocation28_spill]] %s2756_s7 }
   0x6   :  { %13 = vsyncpa [#allocation3], 0 }
   0x7   :  { %15 = vsyncpa [#allocation3 + $0x1], 0 }
   0x8   :  { %16 = vsyncpa [#allocation6], 0 }
   0x9   :  { %18 = vsyncpa [#allocation6 + $0x1], 0 }
   0xa   :  { %19 = vsyncpa [#allocation9], 0 }
   0xb   :  { %21 = vsyncpa [#allocation9 + $0x1], 0 }
   0xc   :  { %22 = vsyncpa [#allocation4], 0 }
   0xd   :  { %24 = vsyncpa [#allocation4 + $0x1], 0 }
   0xe   :  { %25 = vsyncpa [#allocation13], 0 }
   0xf   :  { %27 = vsyncpa [#allocation13 + $0x1], 0  ;;  %s2192_s24 = smov 0   ;;  %s2194_s25 = smov 0  }
  0x10   :  { %s2196_s26 = smov 0   ;;  %s2198_s27 = smov 0  }
  0x11 LB: > { %2777 = sst [smem:[#allocation19_spill]] %s2126_s24  ;;  %s2213_s28 = sadd.s32 4294967295, %s2138_s27   ;;  %s2138_s27 = sphi %s2198_s27, %s2813_s27   ;;  %s2134_s26 = sphi %s2196_s26, %s2817_s26   ;;  %s2130_s25 = sphi %s2194_s25, %s2816_s25   ;;  %s2126_s24 = sphi %s2192_s24, %s2815_s24  }
  0x12   : > { %2778 = sst [smem:[#allocation20_spill]] %s2138_s27  ;;  %s1578_s29 = sadd.s32 4294967294, %s2138_s27  }
  0x13   : > { %s2217_s30 = sadd.s32 1, %s2138_s27   ;;  %s40_s8 = sadd.s32 1, %s2134_s26 }
  0x14   : > { %2779 = sst [smem:[#allocation21_spill]] %s2217_s30  ;;  %s37_s9 = ssub.s32 %s2138_s27, %s2217_s30 }
  0x15   : > { %p47_p0 = scmp.ne.s32.totalorder %s2134_s26, %s2130_s25  ;;  %p38_p1 = scmp.eq.s32.totalorder %s37_s9, 0 }
  0x16   : > { %p48_p2 = scmp.eq.s32.totalorder %s2138_s27, 0  ;;  %p53_p3 = scmp.ne.s32.totalorder %s2130_s25, %s2126_s24 }
  0x17   : > { %p54_p4 = scmp.eq.s32.totalorder %s2213_s28, 0  ;;  %p207_p7 = scmp.eq.s32.totalorder %s2213_s28, 1 }
  0x18   : > { %s2229_s10 = scalar_select %p38_p1, %s2134_s26, %s40_s8  }
  0x19   : > { %p49_p5 = por %p48_p2, %p47_p0  ;;  %p2231_p6 = por %p54_p4, %p53_p3 }
  0x1a   : > { %2780 = sst [smem:[#allocation22_spill]] %s2229_s10  ;;  %p213_p8 = scmp.eq.s32.totalorder %s1578_s29, 1 }
  0x1b   : > { %s2781_s11 = scalar_select %p2231_p6, 1, 0 }
  0x1c   : > { %p1811_p10 = scmp.lt.s32.totalorder %s2138_s27, 2  ;;  %p2238_p11 = por %p207_p7, %p47_p0 }
  0x1d   : > { %p2242_p12 = por %p213_p8, %p53_p3  ;;  %s2757_s14 = sand.u32 1, %s2134_s26  }
  0x1e   : > { %s2782_s12 = scalar_select %p2238_p11, 1, 0 }
  0x1f   : > { %s2783_s13 = scalar_select %p2242_p12, 1, 0 }
  0x20   : > { %s2248_s15 = sshll.u32 %s2138_s27, 10  ;;  %s2252_s16 = sshll.u32 %s2757_s14, 6 }
  0x21   : > { %2784 = sst [smem:[#allocation23_spill]] %s2783_s13  ;;  %p2254_p13 = pnand %p1811_p10, %p49_p5 }
  0x22   : > { %s2758_s18 = sand.u32 1, %s2138_s27   ;;  %s2786_s1 = sld [smem:[#allocation25_spill]] }
  0x23   : > { %s284_s22 = scalar_lea.vmem [#allocation5], %s2252_s16  ;;  %s2271_s29 = scalar_lea.sflag [#allocation6], %s2758_s18 }
  0x24   : > { %s291_s23 = sshll.u32 %s284_s22, 4  ;;  %p2277_p2 = pneg %p2254_p13  ;;  %s2266_s23 = int_to_ptr.vmem [resolvable:$true] %s291_s23 }
  0x28   : > { %s2263_s21 = scalar_lea.hbm %s2786_s1, %s2248_s15  ;;  %s1887_s22 = scalar_lea.hbm %s2786_s1, 2048 }
  0x29   : > { %s1882_s8 = scalar_lea.hbm %s2263_s21, 1024  ;;  %p1888_p5 = scmp.lt.u32.totalorder %s2263_s21, %s2786_s1 }
  0x2a   : > { %p1883_p1 = scmp.ne.s32.totalorder %s2263_s21, %s1882_s8  ;;  %p1889_p7 = scmp.lt.u32.totalorder %s1887_s22, %s1882_s8 }
  0x2b   : > { %p1891_p10 = scmp.lt.u32.totalorder %s1882_s8, %s2263_s21 }
  0x2c   : > { %p1885_p3 = pnand %p2277_p2, %p1883_p1  ;;  %p1890_p8 = por %p1889_p7, %p1888_p5 }
  0x2e   : > { %p1886_p4 = pneg %p1885_p3  ;;  %p1892_p9 = por %p1891_p10, %p1890_p8 }
  0x30   : > { %p1893_p0 = pnand %p1892_p9, %p1886_p4 }
  0x32   : > { %1896 = shalt.err (!%p1893_p0)
}
  0x33   : > { %s1897_s18 = scalar_lea.vmem %s2266_s23, 1024  ;;  %s2140_s19 = smov [#allocation5]  }
  0x34   : > { %p1898_p1 = scmp.ne.s32.totalorder %s2266_s23, %s1897_s18  ;;  %s1902_s20 = sshll.u32 %s2140_s19, 4  ;;  %s1903_s20 = int_to_ptr.vmem [resolvable:$false] %s1902_s20 }
  0x35   : > { %s1904_s10 = scalar_lea.vmem %s1903_s20, 2048  ;;  %p1905_p11 = scmp.lt.s32.totalorder %s2266_s23, %s1903_s20 }
  0x36   : > { %p1900_p3 = pnand %p1898_p1, %p2277_p2  ;;  %p1906_p6 = scmp.lt.s32.totalorder %s1904_s10, %s1897_s18 }
  0x38   : > { %p1901_p12 = pneg %p1900_p3  ;;  %p1907_p5 = por %p1906_p6, %p1905_p11 }
  0x3a   : > { %p1908_p7 = pnand %p1907_p5, %p1901_p12 }
  0x3c   : > { %1911 = shalt.err (!%p1908_p7)
}
  0x3d   : > { %s2761_s14 = smov 128   ;;  %s2763_s8 = smov 8  }
  0x3e   : > { %1794 = dma.hbm_to_vmem [thread:$0]  (!%p2254_p13), %s2263_s21, 1024, %s2266_s23, %s2271_s29, %s2761_s14, %s2761_s14, %s2763_s8  }
  0x3f   : > { %p370_p6 = scmp.lt.s32.totalorder %s2138_s27, 3  ;;  %s2788_s3 = sld [smem:[#allocation26_spill]] }
  0x40   : > { %p2789_p9 = scmp.ge.s32.totalorder %s2138_s27, 1  ;;  %s326_s10 = scalar_lea.vmem [#allocation8], %s2252_s16 }
  0x41   : > { %s333_s1 = sshll.u32 %s326_s10, 4  ;;  %s2791_s21 = sand.u32 1, %s2138_s27   ;;  %s2318_s1 = int_to_ptr.vmem [resolvable:$true] %s333_s1 }
  0x42   : > { %p2313_p11 = pnand %p2789_p9, %p370_p6  ;;  %s2322_s23 = scalar_lea.sflag [#allocation9], %s2791_s21 }
  0x44   : > { %s2790_s20 = scalar_select %p2313_p11, 1, 0 }
  0x45   : > { %s2309_s19 = scalar_lea.hbm %s2788_s3, %s2248_s15  ;;  %s1917_s8 = scalar_lea.hbm %s2788_s3, 2048 }
  0x46   : > { %s1912_s14 = scalar_lea.hbm %s2309_s19, 1024  ;;  %p1918_p8 = scmp.lt.u32.totalorder %s2309_s19, %s2788_s3 }
  0x47   : > { %p1913_p12 = scmp.ne.s32.totalorder %s2309_s19, %s1912_s14  ;;  %p1919_p10 = scmp.lt.u32.totalorder %s1917_s8, %s1912_s14 }
  0x48   : > { %p1921_p3 = scmp.lt.u32.totalorder %s1912_s14, %s2309_s19 }
  0x49   : > { %p1915_p0 = pnand %p1913_p12, %p2277_p2  ;;  %p1920_p1 = por %p1919_p10, %p1918_p8 }
  0x4b   : > { %p1916_p4 = pneg %p1915_p0  ;;  %p1922_p5 = por %p1921_p3, %p1920_p1 }
  0x4d   : > { %p1923_p7 = pnand %p1922_p5, %p1916_p4 }
  0x4f   : > { %1926 = shalt.err (!%p1923_p7)
}
  0x50   : > { %s1927_s10 = scalar_lea.vmem %s2318_s1, 1024  ;;  %s2143_s21 = smov [#allocation8]  }
  0x51   : > { %p1928_p6 = scmp.ne.s32.totalorder %s2318_s1, %s1927_s10  ;;  %s1932_s18 = sshll.u32 %s2143_s21, 4  ;;  %s1933_s18 = int_to_ptr.vmem [resolvable:$false] %s1932_s18 }
  0x52   : > { %s1934_s30 = scalar_lea.vmem %s1933_s18, 2048  ;;  %p1935_p0 = scmp.lt.s32.totalorder %s2318_s1, %s1933_s18 }
  0x53   : > { %p1930_p9 = pnand %p1928_p6, %p2277_p2  ;;  %p1936_p11 = scmp.lt.s32.totalorder %s1934_s30, %s1927_s10 }
  0x55   : > { %p1931_p12 = pneg %p1930_p9  ;;  %p1937_p8 = por %p1936_p11, %p1935_p0 }
  0x57   : > { %p1938_p10 = pnand %p1937_p8, %p1931_p12 }
  0x59   : > { %1941 = shalt.err (!%p1938_p10)
}
  0x5a   : > { %s2792_s13 = smov 8   ;;  %s2793_s14 = smov 128  }
  0x5b   : > { %1800 = dma.hbm_to_vmem [thread:$0]  (!%p2254_p13), %s2309_s19, 1024, %s2318_s1, %s2322_s23, %s2793_s14, %s2793_s14, %s2792_s13  }
  0x5c   : > { %s2794_s0 = sld [smem:[#allocation24_spill]]  ;;  %s263_s21 = scalar_lea.vmem [#allocation2], %s2252_s16 }
  0x5d   : > { %s270_s18 = sshll.u32 %s263_s21, 4  ;;  %s2362_s27 = scalar_lea.hbm %s2751_s2, %s2248_s15  ;;  %s2356_s18 = int_to_ptr.vmem [resolvable:$true] %s270_s18 }
  0x5e   : > { %s2795_s24 = sand.u32 1, %s2134_s26  }
  0x5f   : > { %s2366_s1 = scalar_lea.sflag [#allocation3], %s2795_s24 }
  0x62   : > { %s2353_s10 = scalar_lea.hbm %s2794_s0, %s2248_s15  ;;  %s1947_s6 = scalar_lea.hbm %s2794_s0, 2048 }
  0x63   : > { %s1942_s19 = scalar_lea.hbm %s2353_s10, 1024  ;;  %p1948_p3 = scmp.lt.u32.totalorder %s2353_s10, %s2794_s0 }
  0x64   : > { %p1943_p11 = scmp.ne.s32.totalorder %s2353_s10, %s1942_s19  ;;  %p1949_p5 = scmp.lt.u32.totalorder %s1947_s6, %s1942_s19 }
  0x65   : > { %p1951_p6 = scmp.lt.u32.totalorder %s1942_s19, %s2353_s10 }
  0x66   : > { %p1945_p4 = pnand %p1943_p11, %p2277_p2  ;;  %p1950_p7 = por %p1949_p5, %p1948_p3 }
  0x68   : > { %p1946_p1 = pneg %p1945_p4  ;;  %p1952_p9 = por %p1951_p6, %p1950_p7 }
  0x6a   : > { %p1953_p12 = pnand %p1952_p9, %p1946_p1 }
  0x6c   : > { %1956 = shalt.err (!%p1953_p12)
}
  0x6d   : > { %s1957_s3 = scalar_lea.vmem %s2356_s18, 1024  ;;  %s2144_s24 = smov [#allocation2]  }
  0x6e   : > { %p1958_p0 = scmp.ne.s32.totalorder %s2356_s18, %s1957_s3  ;;  %s1962_s30 = sshll.u32 %s2144_s24, 4  ;;  %s1963_s30 = int_to_ptr.vmem [resolvable:$false] %s1962_s30 }
  0x6f   : > { %s1964_s7 = scalar_lea.vmem %s1963_s30, 2048  ;;  %p1965_p11 = scmp.lt.s32.totalorder %s2356_s18, %s1963_s30 }
  0x70   : > { %p1960_p8 = pnand %p1958_p0, %p2277_p2  ;;  %p1966_p4 = scmp.lt.s32.totalorder %s1964_s7, %s1957_s3 }
  0x72   : > { %p1961_p10 = pneg %p1960_p8  ;;  %p1967_p3 = por %p1966_p4, %p1965_p11 }
  0x74   : > { %p1968_p5 = pnand %p1967_p3, %p1961_p10 }
  0x76   : > { %1971 = shalt.err (!%p1968_p5)
}
  0x77   : > { %1791 = dma.hbm_to_vmem [thread:$0]  (!%p2254_p13), %s2353_s10, 1024, %s2356_s18, %s2366_s1, %s2793_s14, %s2793_s14, %s2792_s13  }
  0x78   : > { %s305_s6 = scalar_lea.vmem [#allocation7], %s2252_s16  ;;  %s2400_s21 = scalar_lea.hbm %s2753_s4, %s2248_s15 }
  0x79   : > { %s312_s19 = sshll.u32 %s305_s6, 4  ;;  %s1972_s3 = scalar_lea.hbm %s2362_s27, 1024  ;;  %s2394_s19 = int_to_ptr.vmem [resolvable:$true] %s312_s19 }
  0x7a   : > { %p1973_p1 = scmp.ne.s32.totalorder %s2362_s27, %s1972_s3  ;;  %s1977_s7 = scalar_lea.hbm %s2751_s2, 2048 }
  0x7b   : > { %p1978_p9 = scmp.lt.u32.totalorder %s2362_s27, %s2751_s2  ;;  %p1979_p12 = scmp.lt.u32.totalorder %s1977_s7, %s1972_s3 }
  0x7c   : > { %p1975_p7 = pnand %p1973_p1, %p2277_p2  ;;  %p1981_p8 = scmp.lt.u32.totalorder %s1972_s3, %s2362_s27 }
  0x7d   : > { %p1980_p0 = por %p1979_p12, %p1978_p9 }
  0x7e   : > { %p1976_p6 = pneg %p1975_p7 }
  0x7f   : > { %p1982_p10 = por %p1981_p8, %p1980_p0 }
  0x81   : > { %p1983_p11 = pnand %p1982_p10, %p1976_p6 }
  0x83   : > { %1986 = shalt.err (!%p1983_p11)
}
  0x84   : > { %s1987_s15 = scalar_lea.vmem %s2394_s19, 1024  ;;  %s2145_s18 = smov [#allocation7]  }
  0x85   : > { %p1988_p4 = scmp.ne.s32.totalorder %s2394_s19, %s1987_s15  ;;  %s1992_s1 = sshll.u32 %s2145_s18, 4  ;;  %s1993_s1 = int_to_ptr.vmem [resolvable:$false] %s1992_s1 }
  0x86   : > { %s1994_s0 = scalar_lea.vmem %s1993_s1, 2048  ;;  %p1995_p1 = scmp.lt.s32.totalorder %s2394_s19, %s1993_s1 }
  0x87   : > { %p1990_p3 = pnand %p1988_p4, %p2277_p2  ;;  %p1996_p7 = scmp.lt.s32.totalorder %s1994_s0, %s1987_s15 }
  0x89   : > { %p1991_p5 = pneg %p1990_p3  ;;  %p1997_p9 = por %p1996_p7, %p1995_p1 }
  0x8b   : > { %p1998_p12 = pnand %p1997_p9, %p1991_p5 }
  0x8d   : > { %2001 = shalt.err (!%p1998_p12)
}
  0x8e   : > { %1797 = dma.hbm_to_vmem [thread:$0]  (!%p2254_p13), %s2362_s27, 1024, %s2394_s19, %s2271_s29, %s2793_s14, %s2793_s14, %s2792_s13  }
  0x8f   : > { %s347_s6 = scalar_lea.vmem [#allocation10], %s2252_s16  ;;  %s2002_s22 = scalar_lea.hbm %s2400_s21, 1024 }
  0x90   : > { %s354_s8 = sshll.u32 %s347_s6, 4  ;;  %p2003_p6 = scmp.ne.s32.totalorder %s2400_s21, %s2002_s22  ;;  %s2428_s8 = int_to_ptr.vmem [resolvable:$true] %s354_s8 }
  0x91   : > { %s2007_s30 = scalar_lea.hbm %s2753_s4, 2048  ;;  %p2008_p10 = scmp.lt.u32.totalorder %s2400_s21, %s2753_s4 }
  0x92   : > { %p2005_p0 = pnand %p2003_p6, %p2277_p2  ;;  %p2009_p11 = scmp.lt.u32.totalorder %s2007_s30, %s2002_s22 }
  0x93   : > { %p2011_p3 = scmp.lt.u32.totalorder %s2002_s22, %s2400_s21 }
  0x94   : > { %p2006_p8 = pneg %p2005_p0  ;;  %p2010_p4 = por %p2009_p11, %p2008_p10 }
  0x96   : > { %p2012_p5 = por %p2011_p3, %p2010_p4 }
  0x98   : > { %p2013_p1 = pnand %p2012_p5, %p2006_p8 }
  0x9a   : > { %2016 = shalt.err (!%p2013_p1)
}
  0x9b   : > { %s2017_s27 = scalar_lea.vmem %s2428_s8, 1024  ;;  %s2146_s16 = smov [#allocation10]  }
  0x9c   : > { %p2018_p7 = scmp.ne.s32.totalorder %s2428_s8, %s2017_s27  ;;  %s2022_s29 = sshll.u32 %s2146_s16, 4  ;;  %s2023_s29 = int_to_ptr.vmem [resolvable:$false] %s2022_s29 }
  0x9d   : > { %s2024_s19 = scalar_lea.vmem %s2023_s29, 2048  ;;  %p2025_p6 = scmp.lt.s32.totalorder %s2428_s8, %s2023_s29 }
  0x9e   : > { %p2020_p9 = pnand %p2018_p7, %p2277_p2  ;;  %p2026_p0 = scmp.lt.s32.totalorder %s2024_s19, %s2017_s27 }
  0xa0   : > { %p2021_p12 = pneg %p2020_p9  ;;  %p2027_p10 = por %p2026_p0, %p2025_p6 }
  0xa2   : > { %p2028_p11 = pnand %p2027_p10, %p2021_p12 }
  0xa4   : > { %2031 = shalt.err (!%p2028_p11)
}
  0xa5   : > { %1803 = dma.hbm_to_vmem [thread:$0]  (!%p2254_p13), %s2400_s21, 1024, %s2428_s8, %s2322_s23, %s2793_s14, %s2793_s14, %s2792_s13  }
  0xa6   : > { %p2796_p2 = scmp.ne.s32.totalorder %s2790_s20, 0 }
  0xa7   : > { %s2458_s9 = sand.u32 (!%p2796_p2), 1, %s2130_s25   ;;  %p2797_p8 = scmp.ne.s32.totalorder (!%p2796_p2), %s2781_s11, 0 }
  0xa8   : > { %374 = sbr.rel (%p2796_p2) target bundleno = 970 (0x3ca), region = 44  ;;  %s2461_s15 = sshll.u32 (!%p2796_p2), %s2458_s9, 6 }
  0xa9   : > { %s377_s17 = scalar_lea.sflag (!%p2796_p2), [#allocation3], %s2458_s9  ;;  %s2465_s18 = scalar_lea.vmem (!%p2796_p2), [#allocation2], %s2461_s15 }
  0xaf   : > { %2105 = dma.done.wait (%p2797_p8), %s377_s17, 1024  }
  0xb0   : > { %2107 = vsyncadd (%p2797_p8), %s377_s17, 4294966272  ;;  %s385_s20 = sand.u32 1, %s2213_s28   ;;  %s389_s13 = scalar_lea.vmem [#allocation5], %s2461_s15 }
  0xb1   : > { %s386_s23 = scalar_lea.sflag [#allocation6], %s385_s20 }
  0xb2   : > { %2109 = dma.done.wait (%p2797_p8), %s386_s23, 2048  }
  0xb3   : > { %2111 = vsyncadd (%p2797_p8), %s386_s23, 4294965248  ;;  %s2478_s14 = scalar_lea.vmem [#allocation7], %s2461_s15  ;;  %s404_s21 = scalar_lea.sflag [#allocation9], %s385_s20 }
  0xb4   : > { %s2481_s1 = scalar_lea.vmem [#allocation8], %s2461_s15 }
  0xb5   : > { %2113 = dma.done.wait (%p2797_p8), %s404_s21, 2048  }
  0xb6   : > { %2115 = vsyncadd (%p2797_p8), %s404_s21, 4294965248  ;;  %vm508_vm0 = vcmask 261120   ;;  %v492_v1 = vld [vmem:[%s389_s13] sm:$0xff]  ;;  %v493_v2 = vld [vmem:[%s389_s13 + $0x8] sm:$0xff]  ;;  %p477_p13 = scmp.lt.s32.totalorder %s2213_s28, 1  ;;  %v2147_v23 = vmov 0  }
  0xb7   : > { %vm2489_vm1 = vmpackc.low %vm508_vm0, %vm508_vm0  ;;  %v494_v3 = vld [vmem:[%s389_s13 + $0x10] sm:$0xff]  ;;  %v1734_v4 = vpack.c.bf16 %v493_v2, %v492_v1  ;;  %v495_v5 = vld [vmem:[%s389_s13 + $0x18] sm:$0xff]  ;;  %s2534_s3 = scalar_lea.vmem [#allocation10], %s2461_s15  ;;  %vm903_vm5 = vcmask 130048   ;;  %s2616_s24 = scalar_lea.vmem [#allocation12], %s2461_s15 }
  0xb8   : > { %v484_v6 = vld [vmem:[%s2465_s18] sm:$0xff]  ;;  %v1740_v7 = vpack.c.bf16 %v495_v5, %v494_v3  ;;  %v486_v8 = vld [vmem:[%s2465_s18 + $0x10] sm:$0xff]  ;;  %v497_v10 = vld [vmem:[%s389_s13 + $0x28] sm:$0xff]  ;;  %s478_s11 = scalar_select %p477_p13, %s2213_s28, 1 }
  0xb9   : > { %1682 = vmatprep.mubr.msk.f32.mxu0 %vm508_vm0, %v484_v6  ;;  %v496_v9 = vld [vmem:[%s389_s13 + $0x20] sm:$0xff]  ;;  %1736 = vmatprep.subr.msk.bf16.mxu0 %vm2489_vm1, %v1734_v4  ;;  %v498_v12 = vld [vmem:[%s389_s13 + $0x30] sm:$0xff]  ;;  %v499_v13 = vld [vmem:[%s389_s13 + $0x38] sm:$0xff]  ;;  %s1644_s30 = sshll.u32 %s2213_s28, 10  ;;  %s2804_s27 = sld [smem:[#allocation28_spill]] }
  0xba   : > { %1689 = vmatprep.mubr.msk.f32.mxu1 %vm508_vm0, %v486_v8  ;;  %v1746_v11 = vpack.c.bf16 %v497_v10, %v496_v9  ;;  %1742 = vmatprep.subr.msk.bf16.mxu1 %vm2489_vm1, %v1740_v7  ;;  %v1752_v14 = vpack.c.bf16 %v499_v13, %v498_v12  ;;  %v485_v15 = vld [vmem:[%s2465_s18 + $0x8] sm:$0xff]  ;;  %v487_v16 = vld [vmem:[%s2465_s18 + $0x18] sm:$0xff]  ;;  %v488_v17 = vld [vmem:[%s2465_s18 + $0x20] sm:$0xff]  ;;  %s1643_s0 = sshll.u32 %s478_s11, 2  ;;  %s1375_s19 = sshll.u32 %s2616_s24, 4  ;;  %s2657_s19 = int_to_ptr.vmem [resolvable:$true] %s1375_s19 }
  0xbb   : > { %1739 = vmatpush3.bf16.xpose.msk.msra.mxu0 %vm2489_vm1, %v1734_v4  ;;  %1745 = vmatpush3.bf16.xpose.msk.msra.mxu1 %vm2489_vm1, %v1740_v7  ;;  %v490_v18 = vld [vmem:[%s2465_s18 + $0x30] sm:$0xff]  ;;  %v489_v19 = vld [vmem:[%s2465_s18 + $0x28] sm:$0xff]  ;;  %v491_v20 = vld [vmem:[%s2465_s18 + $0x38] sm:$0xff]  ;;  %s481_s22 = scalar_lea.vmem %s2754_s5, %s1643_s0  ;;  %s1346_s17 = scalar_lea.sflag [#allocation13], %s2458_s9 }
  0xbc   : > { %1748 = vmatprep.subr.msk.bf16.mxu0 %vm2489_vm1, %v1746_v11  ;;  %1754 = vmatprep.subr.msk.bf16.mxu1 %vm2489_vm1, %v1752_v14  ;;  %v882_v21 = vld [vmem:[%s481_s22 + $0x2] sm:$0x3]  ;;  %v881_v22 = vld [vmem:[%s481_s22] sm:$0x3]  ;;  %v501_v25 = vld [vmem:[%s2481_s1 + $0x8] sm:$0xff]  ;;  %s2032_s18 = scalar_lea.vmem %s2657_s19, 1024 }
  0xbd   : > { %vm884_vm2 = vnez %v882_v21  ;;  %vm883_vm3 = vnez %v881_v22  ;;  %v500_v27 = vld [vmem:[%s2481_s1] sm:$0xff]  ;;  %v503_v28 = vld [vmem:[%s2481_s1 + $0x18] sm:$0xff]  ;;  %v858_v30 = vld [vmem:[%s2534_s3 + $0x8] sm:$0xff]  ;;  %p2033_p4 = scmp.ne.s32.totalorder %s2657_s19, %s2032_s18  ;;  %p2806_p3 = scmp.ne.s32.totalorder %s2782_s12, 0 }
  0xbe   : > { %v886_v24 = vsel %vm884_vm2, 16843009, %v2147_v23  ;;  %v885_v26 = vsel %vm883_vm3, 16843009, %v2147_v23  ;;  %v502_v31 = vld [vmem:[%s2481_s1 + $0x10] sm:$0xff]  ;;  %v857_v35 = vld [vmem:[%s2534_s3] sm:$0xff] }
  0xbf   : > { %v888_v32 = vunpack.c.0.s8 %v886_v24  ;;  %v860_v37 = vld [vmem:[%s2534_s3 + $0x18] sm:$0xff]  ;;  %v887_v38 = vunpack.c.0.s8 %v885_v26  ;;  %v859_v42 = vld [vmem:[%s2534_s3 + $0x10] sm:$0xff]  ;;  %v505_v49 = vld [vmem:[%s2481_s1 + $0x28] sm:$0xff]  ;;  %s2805_s16 = smov %s2804_s27  ;;  %s2654_s29 = scalar_lea.hbm %s2804_s27, %s1644_s30 }
  0xc0   : > { %v862_v53 = vld [vmem:[%s2534_s3 + $0x28] sm:$0xff]  ;;  %v506_v54 = vld [vmem:[%s2481_s1 + $0x30] sm:$0xff]  ;;  %v504_v55 = vld [vmem:[%s2481_s1 + $0x20] sm:$0xff]  ;;  %p2034_p5 = pnand %p2033_p4, %p2806_p3  ;;  %s2148_s20 = smov [#allocation12]  }
  0xc1   : > { %vm2541_vm4 = vcmp.ne.s32.totalorder %v888_v32, 0  ;;  %vm2546_vm6 = vcmp.ne.s32.totalorder %v887_v38, 0  ;;  %v507_v58 = vld [vmem:[%s2481_s1 + $0x38] sm:$0xff]  ;;  %v861_v60 = vld [vmem:[%s2534_s3 + $0x20] sm:$0xff]  ;;  %v863_v9 = vld [vmem:[%s2534_s3 + $0x30] sm:$0xff]  ;;  %s2036_s23 = sshll.u32 %s2148_s20, 4  ;;  %s2037_s23 = int_to_ptr.vmem [resolvable:$false] %s2036_s23 }
  0xc2   : > { %1683 = vmatmul.mubr.msk.f32.vlgmr.msra.gmra.mrb[0].mxu0 %vm508_vm0, %v485_v15  ;;  %1690 = vmatmul.mubr.msk.f32.vlgmr.msra.gmra.mrb[0].mxu1 %vm508_vm0, %v487_v16  ;;  %v864_v3 = vld [vmem:[%s2534_s3 + $0x38] sm:$0xff]  ;;  %p2035_p1 = pneg %p2034_p5  ;;  %s2038_s13 = scalar_lea.vmem %s2037_s23, 2048 }
  0xc3   : > { %1751 = vmatpush3.bf16.xpose.msk.msra.mxu0 %vm2489_vm1, %v1746_v11  ;;  %1757 = vmatpush3.bf16.xpose.msk.msra.mxu1 %vm2489_vm1, %v1752_v14  ;;  %p2039_p7 = scmp.lt.s32.totalorder %s2657_s19, %s2037_s23  ;;  %p2040_p9 = scmp.lt.s32.totalorder %s2038_s13, %s2032_s18 }
  0xc4   : > { %1696 = vmatprep.mubr.msk.f32.mxu0 %vm508_vm0, %v488_v17  ;;  %1703 = vmatprep.mubr.msk.f32.mxu1 %vm508_vm0, %v490_v18 }
  0xc5   : > { %p2041_p12 = por %p2040_p9, %p2039_p7 }
  0xc7   : > { %p2042_p6 = pnand %p2041_p12, %p2035_p1 }
  0xca   : > { %1697 = vmatmul.mubr.msk.f32.vlgmr.msra.gmra.mrb[2].mxu0 %vm508_vm0, %v489_v19  ;;  %1704 = vmatmul.mubr.msk.f32.vlgmr.msra.gmra.mrb[2].mxu1 %vm508_vm0, %v491_v20 }
 0x195   : > { %v1684_v29 = vpop.f32.mrb[0].mxu0  ;;  %v1691_v36 = vpop.f32.mrb[0].mxu1 }
 0x196   : > { %v593_v33 = vadd.f32 %v1684_v29, %v501_v25  ;;  %v587_v34 = vpop.f32.mrb[1].mxu0  ;;  %v680_v40 = vadd.f32 %v1691_v36, %v503_v28  ;;  %v674_v41 = vpop.f32.mrb[1].mxu1 }
 0x197   : > { %v588_v39 = vadd.f32 %v587_v34, %v500_v27  ;;  %v675_v44 = vadd.f32 %v674_v41, %v502_v31 }
 0x198   : > { %v866_v43 = vadd.f32 %v858_v30, %v593_v33  ;;  %v868_v46 = vadd.f32 %v860_v37, %v680_v40 }
 0x199   : > { %v865_v45 = vadd.f32 %v857_v35, %v588_v39  ;;  %v867_v48 = vadd.f32 %v859_v42, %v675_v44 }
 0x19a   : > { %v874_v50 = vmul.f32 0.10206208, %v866_v43  ;;  %v876_v52 = vmul.f32 0.10206208, %v868_v46 }
 0x19b   : > { %v873_v56 = vmul.f32 0.10206208, %v865_v45  ;;  %v875_v57 = vmul.f32 0.10206208, %v867_v48 }
 0x19c   : > { %v896_v59 = vsel %vm2541_vm4, -1e+09, %v874_v50  ;;  %v898_v0 = vsel %vm2541_vm4, -1e+09, %v876_v52 }
 0x19d   : > { %v1698_v61 = vpop.f32.mrb[2].mxu0  ;;  %v907_v62 = vsel %vm903_vm5, %v896_v59, -inf  ;;  %v895_v63 = vsel %vm2546_vm6, -1e+09, %v873_v56  ;;  %v1705_v2 = vpop.f32.mrb[2].mxu1  ;;  %v913_v11 = vsel %vm903_vm5, %v898_v0, -inf }
 0x19e   : > { %v767_v1 = vadd.f32 %v1698_v61, %v505_v49  ;;  %908 = vmax.xlane.f32.xlu1 %v907_v62  ;;  %v761_v4 = vpop.f32.mrb[3].mxu0  ;;  %v904_v5 = vsel %vm903_vm5, %v895_v63, -inf  ;;  %v897_v6 = vsel %vm2546_vm6, -1e+09, %v875_v57  ;;  %v854_v7 = vadd.f32 %v1705_v2, %v507_v58  ;;  %v848_v8 = vpop.f32.mrb[3].mxu1 }
 0x19f   : > { %v762_v10 = vadd.f32 %v761_v4, %v504_v55  ;;  %905 = vmax.xlane.f32.xlu0 %v904_v5  ;;  %v849_v13 = vadd.f32 %v848_v8, %v506_v54  ;;  %v910_v14 = vsel %vm903_vm5, %v897_v6, -inf }
 0x1a0   : > { %v870_v12 = vadd.f32 %v862_v53, %v767_v1  ;;  %v872_v15 = vadd.f32 %v864_v3, %v854_v7  ;;  %v1001_v7 = vld [vmem:[%s2478_s14 + $0x8] sm:$0xff] }
 0x1a1   : > { %v869_v16 = vadd.f32 %v861_v60, %v762_v10  ;;  %v871_v17 = vadd.f32 %v863_v9, %v849_v13  ;;  %v1002_v9 = vld [vmem:[%s2478_s14 + $0x10] sm:$0xff]  ;;  %v1003_v10 = vld [vmem:[%s2478_s14 + $0x18] sm:$0xff]  ;;  %v1005_v13 = vld [vmem:[%s2478_s14 + $0x28] sm:$0xff] }
 0x1a2   : > { %914 = vmax.xlane.f32.xlu1 %v913_v11  ;;  %v878_v18 = vmul.f32 0.10206208, %v870_v12  ;;  %v880_v20 = vmul.f32 0.10206208, %v872_v15  ;;  %v1762_v11 = vpack.c.bf16 %v1003_v10, %v1002_v9  ;;  %v1004_v12 = vld [vmem:[%s2478_s14 + $0x20] sm:$0xff]  ;;  %v1006_v15 = vld [vmem:[%s2478_s14 + $0x30] sm:$0xff] }
 0x1a3   : > { %v877_v19 = vmul.f32 0.10206208, %v869_v16  ;;  %911 = vmax.xlane.f32.xlu0 %v910_v14  ;;  %v879_v21 = vmul.f32 0.10206208, %v871_v17  ;;  %v1766_v14 = vpack.c.bf16 %v1005_v13, %v1004_v12  ;;  %v1007_v16 = vld [vmem:[%s2478_s14 + $0x38] sm:$0xff] }
 0x1a4   : > { %v900_v26 = vsel %vm2541_vm4, -1e+09, %v878_v18  ;;  %v902_v27 = vsel %vm2541_vm4, -1e+09, %v880_v20  ;;  %1763 = vmatprep.subr.bf16.mxu1 %v1762_v11  ;;  %v1770_v17 = vpack.c.bf16 %v1007_v16, %v1006_v15 }
 0x1a5   : > { %v899_v22 = vsel %vm2546_vm6, -1e+09, %v877_v19  ;;  %v901_v23 = vsel %vm2546_vm6, -1e+09, %v879_v21  ;;  %v919_v28 = vsel %vm903_vm5, %v900_v26, -inf  ;;  %v925_v29 = vsel %vm903_vm5, %v902_v27, -inf  ;;  %1765 = vmatpush3.bf16.msra.mxu1 %v1762_v11 }
 0x1a6   : > { %v916_v24 = vsel %vm903_vm5, %v899_v22, -inf  ;;  %v922_v25 = vsel %vm903_vm5, %v901_v23, -inf  ;;  %1771 = vmatprep.subr.bf16.mxu1 %v1770_v17 }
 0x1a7   : > { %917 = vmax.xlane.f32.xlu0 %v916_v24  ;;  %923 = vmax.xlane.f32.xlu1 %v922_v25 }
 0x1ab   : > { %920 = vmax.xlane.f32.xlu0 %v919_v28  ;;  %926 = vmax.xlane.f32.xlu1 %v925_v29 }
 0x22b   : > { %v909_v30 = vpop.xlane.xlu1 %908 }
 0x22c   : > { %v929_v31 = vsub.f32 %v896_v59, %v909_v30  ;;  %v906_v32 = vpop.xlane.xlu0 %905 }
 0x22d   : > { %v928_v33 = vsub.f32 %v895_v63, %v906_v32 }
 0x22e   : > { %v938_v34 = vmul.f32 1.442695, %v929_v31 }
 0x22f   : > { %v936_v35 = vmul.f32 1.442695, %v928_v33  ;;  %v915_v36 = vpop.xlane.xlu1 %914 }
 0x230   : > { %1850 = vpow2.f32 %v938_v34  ;;  %v931_v37 = vsub.f32 %v898_v0, %v915_v36  ;;  %v912_v38 = vpop.xlane.xlu0 %911 }
 0x231   : > { %v930_v39 = vsub.f32 %v897_v6, %v912_v38  ;;  %1852 = vpow2.f32 %v936_v35  ;;  %v1000_v6 = vld [vmem:[%s2478_s14] sm:$0xff] }
 0x232   : > { %v942_v40 = vmul.f32 1.442695, %v931_v37  ;;  %v1758_v8 = vpack.c.bf16 %v1001_v7, %v1000_v6 }
 0x233   : > { %v940_v41 = vmul.f32 1.442695, %v930_v39 }
 0x234   : > { %1854 = vpow2.f32 %v942_v40  ;;  %v918_v42 = vpop.xlane.xlu0 %917  ;;  %v924_v43 = vpop.xlane.xlu1 %923  ;;  %1759 = vmatprep.subr.bf16.mxu0 %v1758_v8 }
 0x235   : > { %v932_v44 = vsub.f32 %v899_v22, %v918_v42  ;;  %1856 = vpow2.f32 %v940_v41  ;;  %v934_v45 = vsub.f32 %v901_v23, %v924_v43  ;;  %1761 = vmatpush3.bf16.msra.mxu0 %v1758_v8 }
 0x236   : > { %1767 = vmatprep.subr.bf16.mxu0 %v1766_v14 }
 0x237   : > { %v944_v46 = vmul.f32 1.442695, %v932_v44  ;;  %v948_v47 = vmul.f32 1.442695, %v934_v45 }
 0x238   : > { %v921_v48 = vpop.xlane.xlu0 %920  ;;  %v927_v49 = vpop.xlane.xlu1 %926 }
 0x239   : > { %1858 = vpow2.f32 %v944_v46  ;;  %v933_v50 = vsub.f32 %v900_v26, %v921_v48  ;;  %v935_v52 = vsub.f32 %v902_v27, %v927_v49 }
 0x23a   : > { %v1851_v51 = vpop.eup %1850  ;;  %1860 = vpow2.f32 %v948_v47 }
 0x23b   : > { %v946_v53 = vmul.f32 1.442695, %v933_v50  ;;  %v955_v54 = vsel %vm903_vm5, %v1851_v51, 0.0  ;;  %v2582_v55 = vpop.eup %1852  ;;  %v950_v56 = vmul.f32 1.442695, %v935_v52 }
 0x23c   : > { %956 = vadd.xlane.f32.xlu0 %v955_v54  ;;  %v952_v59 = vsel %vm903_vm5, %v2582_v55, 0.0 }
 0x23d   : > { %1862 = vpow2.f32 %v946_v53 }
 0x23e   : > { %v1855_v57 = vpop.eup %1854  ;;  %1864 = vpow2.f32 %v950_v56 }
 0x23f   : > { %v961_v58 = vsel %vm903_vm5, %v1855_v57, 0.0  ;;  %v2587_v60 = vpop.eup %1856 }
 0x240   : > { %962 = vadd.xlane.f32.xlu1 %v961_v58  ;;  %953 = vadd.xlane.f32.xlu0 %v952_v59  ;;  %v958_v62 = vsel %vm903_vm5, %v2587_v60, 0.0 }
 0x243   : > { %v2589_v61 = vpop.eup %1858 }
 0x244   : > { %v2593_v63 = vpop.eup %1860  ;;  %959 = vadd.xlane.f32.xlu1 %v958_v62  ;;  %v964_v0 = vsel %vm903_vm5, %v2589_v61, 0.0 }
 0x245   : > { %965 = vadd.xlane.f32.xlu0 %v964_v0  ;;  %v970_v2 = vsel %vm903_vm5, %v2593_v63, 0.0 }
 0x247   : > { %v2597_v1 = vpop.eup %1862 }
 0x248   : > { %v2601_v3 = vpop.eup %1864  ;;  %971 = vadd.xlane.f32.xlu1 %v970_v2  ;;  %v967_v4 = vsel %vm903_vm5, %v2597_v1, 0.0 }
 0x249   : > { %968 = vadd.xlane.f32.xlu0 %v967_v4  ;;  %v973_v5 = vsel %vm903_vm5, %v2601_v3, 0.0 }
 0x24c   : > { %974 = vadd.xlane.f32.xlu1 %v973_v5 }
 0x2c9   : > { %v957_v18 = vpop.xlane.xlu0 %956 }
 0x2ca   : > { %1866 = vrcp.f32 %v957_v18 }
 0x2cd   : > { %v963_v19 = vpop.xlane.xlu1 %962  ;;  %v954_v20 = vpop.xlane.xlu0 %953 }
 0x2ce   : > { %1868 = vrcp.f32 %v963_v19 }
 0x2cf   : > { %1870 = vrcp.f32 %v954_v20 }
 0x2d1   : > { %v960_v21 = vpop.xlane.xlu1 %959 }
 0x2d2   : > { %1872 = vrcp.f32 %v960_v21  ;;  %v966_v22 = vpop.xlane.xlu0 %965 }
 0x2d3   : > { %1874 = vrcp.f32 %v966_v22 }
 0x2d4   : > { %v1867_v23 = vpop.eup %1866 }
 0x2d5   : > { %v985_v24 = vmul.f32 %v1867_v23, %v1851_v51  ;;  %v972_v25 = vpop.xlane.xlu1 %971 }
 0x2d6   : > { %1876 = vrcp.f32 %v972_v25  ;;  %v969_v26 = vpop.xlane.xlu0 %968 }
 0x2d7   : > { %993 = vst.msk [vmem:[%s2616_s24 + $0x8] sm:$0xff] %vm903_vm5, %v985_v24  ;;  %1878 = vrcp.f32 %v969_v26 }
 0x2d8   : > { %v1869_v27 = vpop.eup %1868 }
 0x2d9   : > { %v1871_v28 = vpop.eup %1870  ;;  %v987_v29 = vmul.f32 %v1869_v27, %v1855_v57  ;;  %v975_v30 = vpop.xlane.xlu1 %974 }
 0x2da   : > { %1880 = vrcp.f32 %v975_v30  ;;  %v984_v31 = vmul.f32 %v1871_v28, %v2582_v55 }
 0x2db   : > { %995 = vst.msk [vmem:[%s2616_s24 + $0x18] sm:$0xff] %vm903_vm5, %v987_v29 }
 0x2dc   : > { %v1873_v32 = vpop.eup %1872  ;;  %992 = vst.msk [vmem:[%s2616_s24] sm:$0xff] %vm903_vm5, %v984_v31  ;;  %1710 = vmatprep.mubr.msk.f32.mxu0 %vm903_vm5, %v984_v31 }
 0x2dd   : > { %v1875_v33 = vpop.eup %1874  ;;  %1711 = vmatmul.mubr.msk.f32.vlgmr.msra.gmra.mrb[4].mxu0 %vm903_vm5, %v985_v24  ;;  %v986_v34 = vmul.f32 %v1873_v32, %v2587_v60 }
 0x2de   : > { %v988_v35 = vmul.f32 %v1875_v33, %v2589_v61  ;;  %1769 = vmatpush3.bf16.msra.mxu0 %v1766_v14 }
 0x2df   : > { %994 = vst.msk [vmem:[%s2616_s24 + $0x10] sm:$0xff] %vm903_vm5, %v986_v34  ;;  %1717 = vmatprep.mubr.msk.f32.mxu1 %vm903_vm5, %v986_v34 }
 0x2e0   : > { %v1877_v36 = vpop.eup %1876  ;;  %1718 = vmatmul.mubr.msk.f32.vlgmr.msra.gmra.mrb[4].mxu1 %vm903_vm5, %v987_v29  ;;  %996 = vst.msk [vmem:[%s2616_s24 + $0x20] sm:$0xff] %vm903_vm5, %v988_v35  ;;  %1724 = vmatprep.mubr.msk.f32.mxu0 %vm903_vm5, %v988_v35 }
 0x2e1   : > { %v1879_v37 = vpop.eup %1878  ;;  %1773 = vmatpush3.bf16.msra.mxu1 %v1770_v17  ;;  %v990_v38 = vmul.f32 %v1877_v36, %v2593_v63 }
 0x2e2   : > { %v989_v39 = vmul.f32 %v1879_v37, %v2597_v1 }
 0x2e3   : > { %998 = vst.msk [vmem:[%s2616_s24 + $0x30] sm:$0xff] %vm903_vm5, %v990_v38  ;;  %1731 = vmatprep.mubr.msk.f32.mxu1 %vm903_vm5, %v990_v38 }
 0x2e4   : > { %v1881_v40 = vpop.eup %1880  ;;  %997 = vst.msk [vmem:[%s2616_s24 + $0x28] sm:$0xff] %vm903_vm5, %v989_v39  ;;  %1725 = vmatmul.mubr.msk.f32.vlgmr.msra.gmra.mrb[6].mxu0 %vm903_vm5, %v989_v39 }
 0x2e5   : > { %v991_v41 = vmul.f32 %v1881_v40, %v2601_v3 }
 0x2e7   : > { %999 = vst.msk [vmem:[%s2616_s24 + $0x38] sm:$0xff] %vm903_vm5, %v991_v41  ;;  %1732 = vmatmul.mubr.msk.f32.vlgmr.msra.gmra.mrb[6].mxu1 %vm903_vm5, %v991_v41 }
 0x2e8   : > { %2045 = shalt.err (!%p2042_p6)
}
 0x2e9   : > { %s2046_s14 = scalar_lea.hbm %s2654_s29, 1024  ;;  %s2050_s11 = scalar_lea.hbm %s2805_s16, 2048 }
 0x2ea   : > { %p2047_p0 = scmp.ne.s32.totalorder %s2654_s29, %s2046_s14  ;;  %p2051_p2 = scmp.lt.u32.totalorder %s2654_s29, %s2805_s16 }
 0x2eb   : > { %p2052_p8 = scmp.lt.u32.totalorder %s2050_s11, %s2046_s14  ;;  %p2054_p4 = scmp.lt.u32.totalorder %s2046_s14, %s2654_s29 }
 0x2ec   : > { %p2048_p10 = pnand %p2047_p0, %p2806_p3 }
 0x2ed   : > { %p2053_p13 = por %p2052_p8, %p2051_p2 }
 0x2ee   : > { %p2049_p11 = pneg %p2048_p10 }
 0x2ef   : > { %p2055_p5 = por %p2054_p4, %p2053_p13 }
 0x2f1   : > { %p2056_p1 = pnand %p2055_p5, %p2049_p11 }
 0x2f3   : > { %2059 = shalt.err (!%p2056_p1)
}
 0x2f4   : > { %s2149_s8 = smov 128   ;;  %s2150_s22 = smov 8  }
 0x2f5   : > { %1785 = dma.vmem_to_hbm [thread:$0]  (%p2806_p3), %s2657_s19, 1024, %s2654_s29, %s1346_s17, %s2149_s8, %s2149_s8, %s2150_s22  }
 0x2f6   : > { %s469_s3 = scalar_lea.vmem [#allocation11], %s2461_s15  ;;  %s2807_s10 = sld [smem:[#allocation27_spill]] }
 0x2f7   : > { %s1359_s24 = sshll.u32 %s469_s3, 4  ;;  %s1341_s29 = scalar_lea.sflag [#allocation4], %s2458_s9  ;;  %s2692_s24 = int_to_ptr.vmem [resolvable:$true] %s1359_s24 }
 0x2f8   : > { %s2060_s19 = scalar_lea.vmem %s2692_s24, 1024  ;;  %s2151_s17 = smov [#allocation11]  }
 0x2f9   : > { %p2061_p7 = scmp.ne.s32.totalorder %s2692_s24, %s2060_s19  ;;  %s2064_s18 = sshll.u32 %s2151_s17, 4  ;;  %s2065_s18 = int_to_ptr.vmem [resolvable:$false] %s2064_s18 }
 0x2fa   : > { %s2066_s28 = scalar_lea.vmem %s2065_s18, 2048  ;;  %p2067_p6 = scmp.lt.s32.totalorder %s2692_s24, %s2065_s18 }
 0x2fb   : > { %p2062_p9 = pnand %p2061_p7, %p2806_p3  ;;  %p2068_p0 = scmp.lt.s32.totalorder %s2066_s28, %s2060_s19 }
 0x2fc   : > { %s2700_s27 = scalar_lea.hbm %s2807_s10, %s1644_s30 }
 0x2fd   : > { %p2063_p12 = pneg %p2062_p9  ;;  %p2069_p10 = por %p2068_p0, %p2067_p6 }
 0x2ff   : > { %p2070_p11 = pnand %p2069_p10, %p2063_p12 }
 0x3b0   : > { %v1712_v42 = vpop.f32.mrb[4].mxu0 }
 0x3b1   : > { %1333 = vst.msk [vmem:[%s469_s3 + $0x8] sm:$0xff] %vm508_vm0, %v1712_v42  ;;  %v1080_v43 = vpop.f32.mrb[5].mxu0 }
 0x3b2   : > { %1332 = vst.msk [vmem:[%s469_s3] sm:$0xff] %vm508_vm0, %v1080_v43 }
 0x3b3   : > { %v1719_v44 = vpop.f32.mrb[4].mxu1 }
 0x3b4   : > { %1335 = vst.msk [vmem:[%s469_s3 + $0x18] sm:$0xff] %vm508_vm0, %v1719_v44  ;;  %v1161_v45 = vpop.f32.mrb[5].mxu1 }
 0x3b5   : > { %1334 = vst.msk [vmem:[%s469_s3 + $0x10] sm:$0xff] %vm508_vm0, %v1161_v45 }
 0x3b7   : > { %v1726_v46 = vpop.f32.mrb[6].mxu0 }
 0x3b8   : > { %1337 = vst.msk [vmem:[%s469_s3 + $0x28] sm:$0xff] %vm508_vm0, %v1726_v46  ;;  %v1242_v47 = vpop.f32.mrb[7].mxu0 }
 0x3b9   : > { %1336 = vst.msk [vmem:[%s469_s3 + $0x20] sm:$0xff] %vm508_vm0, %v1242_v47 }
 0x3ba   : > { %v1733_v48 = vpop.f32.mrb[6].mxu1 }
 0x3bb   : > { %1339 = vst.msk [vmem:[%s469_s3 + $0x38] sm:$0xff] %vm508_vm0, %v1733_v48  ;;  %v1323_v49 = vpop.f32.mrb[7].mxu1 }
 0x3bc   : > { %1338 = vst.msk [vmem:[%s469_s3 + $0x30] sm:$0xff] %vm508_vm0, %v1323_v49 }
 0x3bd   : > { %2073 = shalt.err (!%p2070_p11)
}
 0x3be   : > { %s2074_s30 = scalar_lea.hbm %s2700_s27, 1024  ;;  %s2078_s13 = scalar_lea.hbm %s2807_s10, 2048 }
 0x3bf   : > { %p2075_p2 = scmp.ne.s32.totalorder %s2700_s27, %s2074_s30  ;;  %p2079_p4 = scmp.lt.u32.totalorder %s2700_s27, %s2807_s10 }
 0x3c0   : > { %p2080_p5 = scmp.lt.u32.totalorder %s2078_s13, %s2074_s30  ;;  %p2082_p7 = scmp.lt.u32.totalorder %s2074_s30, %s2700_s27 }
 0x3c1   : > { %p2076_p8 = pnand %p2075_p2, %p2806_p3 }
 0x3c2   : > { %p2081_p1 = por %p2080_p5, %p2079_p4 }
 0x3c3   : > { %p2077_p13 = pneg %p2076_p8 }
 0x3c4   : > { %p2083_p9 = por %p2082_p7, %p2081_p1 }
 0x3c6   : > { %p2084_p12 = pnand %p2083_p9, %p2077_p13 }
 0x3c8   : > { %2087 = shalt.err (!%p2084_p12)
}
 0x3c9   : > { %1784 = dma.vmem_to_hbm [thread:$0]  (%p2806_p3), %s2692_s24, 1024, %s2700_s27, %s1341_s29, %s2149_s8, %s2149_s8, %s2150_s22  }
 0x3ca PF: > { %s2808_s1 = sld [smem:[#allocation19_spill]]  ;;  %s2809_s11 = sld [smem:[#allocation23_spill]] }
 0x3cb   : > { %s2810_s0 = sld [smem:[#allocation20_spill]] }
 0x3d0   : > { %s1390_s6 = sand.u32 1, %s2808_s1   ;;  %p2811_p6 = scmp.ne.s32.totalorder %s2809_s11, 0 }
 0x3d1   : > { %p2812_p0 = scmp.ge.s32.totalorder %s2810_s0, 2  ;;  %s1391_s3 = scalar_lea.sflag [#allocation4], %s1390_s6 }
 0x3d3   : > { %p1805_p10 = pnand %p2812_p0, %p2811_p6 }
 0x3d5   : > { %2117 = dma.done.wait (!%p1805_p10), %s1391_s3, 1024  }
 0x3d6   : > { %2119 = vsyncadd (!%p1805_p10), %s1391_s3, 4294966272  ;;  %s1400_s12 = scalar_lea.sflag [#allocation13], %s1390_s6 }
 0x3d7   : > { %2121 = dma.done.wait (!%p1805_p10), %s1400_s12, 1024  }
 0x3d8   : > { %2123 = vsyncadd (!%p1805_p10), %s1400_s12, 4294966272  ;;  %s2813_s27 = sld [smem:[#allocation21_spill]]  ;;  %s2814_s9 = sld [smem:[#allocation22_spill]] }
 0x3d9   : > { %s2815_s24 = smov %s2130_s25  ;;  %s2816_s25 = smov %s2134_s26 }
 0x3de   : > { %p30_p3 = scmp.ge.s32.totalorder %s2813_s27, 4   ;;  %s2817_s26 = smov %s2814_s9 }
 0x3e0   :  { %32 = sbr.rel (!%p30_p3) target bundleno = 17 (0x11), region = 157 }
 0x3e7   :  { %1405 = vsyncpa [#allocation3], 1 }
 0x3e8   :  { %1407 = vsyncpa [#allocation3 + $0x1], 1 }
 0x3e9   :  { %1408 = vsyncpa [#allocation6], 1 }
 0x3ea   :  { %1410 = vsyncpa [#allocation6 + $0x1], 1 }
 0x3eb   :  { %1411 = vsyncpa [#allocation9], 1 }
 0x3ec   :  { %1413 = vsyncpa [#allocation9 + $0x1], 1 }
 0x3ed   :  { %1414 = vsyncpa [#allocation4], 1 }
 0x3ee   :  { %1416 = vsyncpa [#allocation4 + $0x1], 1 }
 0x3ef   :  { %1417 = vsyncpa [#allocation13], 1 }
 0x3f0   :  { %1419 = vsyncpa [#allocation13 + $0x1], 1 }

</bundles_post_ra>
